<compile_context>
chip_gen: v5e
topology: v5e:2x2
jax: 0.10.0
libtpu: 0.0.40
codegen_flags: <defaults>
</compile_context>

<pallas_src>
import functools

import jax
import jax.numpy as jnp
from jax import lax
from jax.experimental import pallas as pl
from jax.experimental.pallas import tpu as pltpu


# ~2 MiB per tile: with input + output double-buffered this is ~8 MiB of scoped
# VMEM, safely inside every generation's default budget.
_TARGET_TILE_BYTES = 2 << 20


def _round_up(x, m):
    return (x + m - 1) // m * m


def _sublane_rows(itemsize):
    # Rows per packed sublane group: 8 for f32, 16 for bf16, 32 for int8/fp8.
    return 8 * max(1, 4 // itemsize)


def _plan_rows(R, row_bytes, itemsize, target_bytes):
    """Row-block size for a 2-D (rows, lanes) view: multiple of the dtype's sublane
    packing, tile <= target_bytes, and >= 2 blocks when possible (v7x dual TC)."""
    sub = _sublane_rows(itemsize)
    if R <= sub:
        return R
    rb = max(sub, (target_bytes // max(row_bytes, 1)) // sub * sub)
    if rb >= R:
        rb = _round_up(-(-R // 2), sub) if R >= 2 * sub else R
    return rb


def _plan_cols(C, max_w, itemsize, target_bytes):
    """Column (lane) block size for the band kernel: multiple of 128, wide enough
    that at most ceil(max_w/cb)+1 blocks cover the band, capped by the VMEM budget."""
    if C % 128 != 0:
        return C  # must take the full extent (last-dim rule); callers avoid this path
    sub = _sublane_rows(itemsize)
    cap = max(128, (target_bytes // (sub * itemsize)) // 128 * 128)
    cb = min(C, _round_up(max(min(max_w, C), 1), 128))
    return min(cb, cap)


# ---------------------------------------------------------------------------
# In-place band-zeroing kernel (main path).
# ---------------------------------------------------------------------------
def _zero_band_kernel(params_ref, x_ref, o_ref, *, cb):
    """Zero columns [c_start, c_end) of the current (rb, cb) tile (RMW)."""
    c_start = params_ref[0]
    c_end = params_ref[1]
    blk = params_ref[2] + pl.program_id(1)          # covering column block index
    col = blk * cb + lax.broadcasted_iota(jnp.int32, (1, cb), 1)
    keep = (col < c_start) | (col >= c_end)         # (1, cb), broadcasts over rows
    o_ref[...] = jnp.where(keep, x_ref[...], jnp.zeros((), o_ref.dtype))


def _zero_col_band_inplace(x2, c_start, c_end, max_w,
                           target_bytes=_TARGET_TILE_BYTES):
    """In-place zeroing of a dynamic contiguous column band of a 2-D array.

    Only the n_cover column blocks covering [c_start, c_end) (band width <= max_w)
    are read, masked and written back; the rest of the (aliased) array is never
    touched by any DMA.
    """
    R, C = x2.shape
    itemsize = x2.dtype.itemsize
    cb = _plan_cols(C, max_w, itemsize, target_bytes)
    rb = _plan_rows(R, cb * itemsize, itemsize, target_bytes)
    nb = pl.cdiv(C, cb)
    n_cover = max(1, min(pl.cdiv(max_w, cb) + 1, nb))

    # First covering block, clamped so the n_cover visited blocks are distinct and
    # in range (=> no output-block revisits, no read/write aliasing hazards).
    b0 = jnp.minimum(c_start // cb, nb - n_cover)
    params = jnp.stack([c_start, c_end, b0]).astype(jnp.int32)

    def index_map(i, j, p):  # p = scalar-prefetch params (SMEM)
        return (i, p[2] + j)

    return pl.pallas_call(
        functools.partial(_zero_band_kernel, cb=cb),
        out_shape=jax.ShapeDtypeStruct(x2.shape, x2.dtype),
        grid_spec=pltpu.PrefetchScalarGridSpec(
            num_scalar_prefetch=1,
            grid=(pl.cdiv(R, rb), n_cover),
            in_specs=[pl.BlockSpec((rb, cb), index_map)],
            out_specs=pl.BlockSpec((rb, cb), index_map),
        ),
        # x2 (operand index 1, after the scalar-prefetch params) aliases the output:
        # untouched blocks keep their original contents.
        input_output_aliases={1: 0},
        compiler_params=pltpu.CompilerParams(
            dimension_semantics=("parallel", "arbitrary"),
        ),
    )(params, x2)


# ---------------------------------------------------------------------------
# Streaming broadcast-select kernel (fallback for lane-unaligned T).
# ---------------------------------------------------------------------------
def _select_kernel(keep_ref, x_ref, o_ref):
    o_ref[...] = jnp.where(keep_ref[...] != 0, x_ref[...],
                           jnp.zeros((), o_ref.dtype))


def _masked_select_pallas(x3, keep3, target_bytes=_TARGET_TILE_BYTES):
    """o = keep ? x : 0 over a (B*C, F, T) view; keep is a precomputed (1, F, T)
    int32 mask so the kernel body is a single broadcast select."""
    BC, F, T = x3.shape
    itemsize = x3.dtype.itemsize
    g = _sublane_rows(itemsize)
    if F <= g:
        fb = F
    else:
        fb = min(F, max(g, (target_bytes // max(T * itemsize, 1)) // g * g))
    rb = max(1, min(BC, target_bytes // max(fb * T * itemsize, 1)))
    if rb >= BC and BC >= 2:
        rb = -(-BC // 2)  # >= 2 row blocks so both v7x TensorCores participate
    # F-axis outer so the (small) mask block stays resident across the row sweep.
    grid = (pl.cdiv(F, fb), pl.cdiv(BC, rb))
    return pl.pallas_call(
        _select_kernel,
        out_shape=jax.ShapeDtypeStruct(x3.shape, x3.dtype),
        grid=grid,
        in_specs=[
            pl.BlockSpec((1, fb, T), lambda f, r: (0, f, 0)),
            pl.BlockSpec((rb, fb, T), lambda f, r: (r, f, 0)),
        ],
        out_specs=pl.BlockSpec((rb, fb, T), lambda f, r: (r, f, 0)),
        compiler_params=pltpu.CompilerParams(
            dimension_semantics=("arbitrary", "parallel"),
        ),
    )(keep3, x3)


# ---------------------------------------------------------------------------
# Wrapper: random draws (control glue, plain JAX) + dispatch.
# ---------------------------------------------------------------------------
def _draw_mask_params(key, F, T, time_mask_max, freq_mask_max, prob):
    """Draws matching torchaudio's mask_along_axis (mask shared across batch/channel):
    value = U*mask_max, start = floor(U*(size-value)), end = start + floor(value)."""
    k_gate, k_tv, k_tm, k_fv, k_fm = jax.random.split(key, 5)
    gate = jax.random.uniform(k_gate, ()) <= prob  # torch: skip iff rand > prob

    t_val = jax.random.uniform(k_tv, ()) * time_mask_max
    t_start = jnp.floor(jax.random.uniform(k_tm, ()) * (T - t_val)).astype(jnp.int32)
    t_end = t_start + jnp.floor(t_val).astype(jnp.int32)

    f_val = jax.random.uniform(k_fv, ()) * freq_mask_max
    f_start = jnp.floor(jax.random.uniform(k_fm, ()) * (F - f_val)).astype(jnp.int32)
    f_end = f_start + jnp.floor(f_val).astype(jnp.int32)
    return gate, t_start, t_end, f_start, f_end


def _mask_reference(x, t_start, t_end, f_start, f_end):
    """Plain-JAX reference; also used as the tiny-input fast path."""
    F, T = x.shape[-2], x.shape[-1]
    t_ids = jnp.arange(T, dtype=jnp.int32)
    f_ids = jnp.arange(F, dtype=jnp.int32)
    masked = ((f_ids >= f_start) & (f_ids < f_end))[:, None] | (
        (t_ids >= t_start) & (t_ids < t_end))[None, :]
    return jnp.where(masked, jnp.zeros((), x.dtype), x)


def time_freq_masking(x, key, *, time_mask_max, freq_mask_max, prob,
                      min_pallas_bytes=256 * 1024,
                      target_tile_bytes=_TARGET_TILE_BYTES):
    """SpecAugment time + frequency masking of x (B, C, F, T), mask_value = 0.

    Donate x at the jit boundary for the in-place path to avoid a defensive copy.
    """
    B, C, F, T = x.shape
    gate, t_start, t_end, f_start, f_end = _draw_mask_params(
        key, F, T, time_mask_max, freq_mask_max, prob)
    # TODO(synk): torchaudio TimeMasking's `p` (max maskable proportion) is left at
    # its default 1.0, matching the reference module which never sets it.

    def apply(xx):
        if xx.size * xx.dtype.itemsize < min_pallas_bytes:
            # pallas_call launch + pipeline prologue dwarfs the work at tiny sizes.
            return _mask_reference(xx, t_start, t_end, f_start, f_end)
        BC = B * C
        if T % 128 == 0:
            # In-place band zeroing: touch only the blocks covering each mask.
            y = _zero_col_band_inplace(xx.reshape(BC, F * T),
                                       f_start * T, f_end * T,
                                       max_w=freq_mask_max * T,
                                       target_bytes=target_tile_bytes)
            y = _zero_col_band_inplace(y.reshape(BC * F, T),
                                       t_start, t_end,
                                       max_w=time_mask_max,
                                       target_bytes=target_tile_bytes)
            return y.reshape(B, C, F, T)
        # Lane-unaligned T: stream the tensor once through a broadcast select with a
        # mask hoisted out of the kernel (no per-step iota / integer divide).
        t_ids = jnp.arange(T, dtype=jnp.int32)
        f_ids = jnp.arange(F, dtype=jnp.int32)
        masked = ((f_ids >= f_start) & (f_ids < f_end))[:, None] | (
            (t_ids >= t_start) & (t_ids < t_end))[None, :]
        keep3 = jnp.where(masked, 0, 1).astype(jnp.int32)[None]  # (1, F, T)
        y = _masked_select_pallas(xx.reshape(BC, F, T), keep3,
                                  target_bytes=target_tile_bytes)
        return y.reshape(B, C, F, T)

    # prob gate hoisted out of the kernels: skipping costs no HBM traffic at all.
    return lax.cond(gate, apply, lambda xx: xx, x)


if __name__ == "__main__":
    # Deterministic "config" (no checkpoint / file reads).
    time_mask_max = 6
    freq_mask_max = 4
    prob = 1.0  # always apply, so the masking kernels are exercised

    key = jax.random.PRNGKey(0)
    k_data, k_aug = jax.random.split(key)

    shapes = [
        (2, 4, 16, 128),  # lane-aligned T  -> in-place band-zeroing kernels
        (2, 4, 16, 16),   # T % 128 != 0    -> streaming broadcast-select kernel
    ]
    for case, (B, C, F, T) in enumerate(shapes):
        x = jax.random.normal(jax.random.fold_in(k_data, case), (B, C, F, T),
                              dtype=jnp.float32)
        fn = jax.jit(functools.partial(
            time_freq_masking,
            time_mask_max=time_mask_max, freq_mask_max=freq_mask_max, prob=prob,
            min_pallas_bytes=0,  # force the Pallas paths even at demo sizes
        ))
        out = jax.block_until_ready(fn(x, k_aug))

        # Reference: identical draws (same key), plain-JAX masking.
        gate, ts, te, fs, fe = _draw_mask_params(
            k_aug, F, T, time_mask_max, freq_mask_max, prob)
        ref = jnp.where(gate, _mask_reference(x, ts, te, fs, fe), x)

        assert out.shape == x.shape and out.dtype == x.dtype
        assert bool(jnp.array_equal(out, ref)), f"mismatch for shape {(B, C, F, T)}"

    print("KERNEL_OK")
</pallas_src>

<mosaic_0001>
module attributes {stable_mosaic.version = 11 : i64} {
  func.func @_zero_band_kernel(%arg0: i32, %arg1: i32, %arg2: memref<3xi32, #tpu.memory_space<smem>>, %arg3: memref<8x512xf32, #tpu.memory_space<vmem>>, %arg4: memref<8x512xf32, #tpu.memory_space<vmem>>) attributes {dimension_semantics = [#tpu.dimension_semantics<parallel>, #tpu.dimension_semantics<arbitrary>], iteration_bounds = array<i64: 1, 2>, scalar_prefetch = 1 : i64, scratch_operands = 0 : i64, tpu.core_type = #tpu.core_type<tc>, window_params = [{transform_indices = @transform_0, window_bounds = array<i64: 8, 512>}, {transform_indices = @transform_1, window_bounds = array<i64: 8, 512>}]} {
    %c0 = arith.constant 0 : index
    %0 = memref.load %arg2[%c0] : memref<3xi32, #tpu.memory_space<smem>>
    %c1 = arith.constant 1 : index
    %1 = memref.load %arg2[%c1] : memref<3xi32, #tpu.memory_space<smem>>
    %c2 = arith.constant 2 : index
    %2 = memref.load %arg2[%c2] : memref<3xi32, #tpu.memory_space<smem>>
    %3 = arith.addi %2, %arg1 : i32
    %c512_i32 = arith.constant 512 : i32
    %4 = arith.muli %3, %c512_i32 : i32
    %5 = tpu.iota {dimensions = array<i32: 1>} : vector<1x512xi32>
    %6 = vector.broadcast %4 : i32 to vector<1x512xi32>
    %7 = arith.addi %6, %5 : vector<1x512xi32>
    %8 = vector.broadcast %0 : i32 to vector<1x512xi32>
    %9 = arith.cmpi slt, %7, %8 : vector<1x512xi32>
    %10 = vector.broadcast %1 : i32 to vector<1x512xi32>
    %11 = arith.cmpi sge, %7, %10 : vector<1x512xi32>
    %12 = arith.ori %9, %11 : vector<1x512xi1>
    %c0_0 = arith.constant 0 : index
    %c0_1 = arith.constant 0 : index
    %13 = vector.load %arg3[%c0_0, %c0_1] : memref<8x512xf32, #tpu.memory_space<vmem>>, vector<8x512xf32>
    %cst = arith.constant 0.000000e+00 : f32
    %14 = vector.shape_cast %12 : vector<1x512xi1> to vector<1x512xi1>
    %15 = vector.broadcast %14 : vector<1x512xi1> to vector<8x512xi1>
    %16 = vector.broadcast %cst : f32 to vector<8x512xf32>
    %17 = arith.select %15, %13, %16 : vector<8x512xi1>, vector<8x512xf32>
    %c0_2 = arith.constant 0 : index
    %c0_3 = arith.constant 0 : index
    %18 = vector.load %arg4[%c0_2, %c0_3] : memref<8x512xf32, #tpu.memory_space<vmem>>, vector<8x512xf32>
    tpu.vector_store %arg4[%c0_2, %c0_3], %17 {strides = array<i32>} : memref<8x512xf32, #tpu.memory_space<vmem>>, vector<8x512xf32>,
    return
  }
  func.func @transform_0(%arg0: i32, %arg1: i32, %arg2: memref<3xi32, #tpu.memory_space<smem>>) -> (i32, i32) {
    %c2 = arith.constant 2 : index
    %0 = memref.load %arg2[%c2] : memref<3xi32, #tpu.memory_space<smem>>
    %1 = arith.addi %0, %arg1 : i32
    %c0_i32 = arith.constant 0 : i32
    return %arg0, %1 : i32, i32
  }
  func.func @transform_1(%arg0: i32, %arg1: i32, %arg2: memref<3xi32, #tpu.memory_space<smem>>) -> (i32, i32) {
    %c2 = arith.constant 2 : index
    %0 = memref.load %arg2[%c2] : memref<3xi32, #tpu.memory_space<smem>>
    %1 = arith.addi %0, %arg1 : i32
    %c0_i32 = arith.constant 0 : i32
    return %arg0, %1 : i32, i32
  }
}

module attributes {stable_mosaic.version = 11 : i64} {
  func.func @_zero_band_kernel(%arg0: i32, %arg1: i32, %arg2: memref<3xi32, #tpu.memory_space<smem>>, %arg3: memref<64x128xf32, #tpu.memory_space<vmem>>, %arg4: memref<64x128xf32, #tpu.memory_space<vmem>>) attributes {dimension_semantics = [#tpu.dimension_semantics<parallel>, #tpu.dimension_semantics<arbitrary>], iteration_bounds = array<i64: 2, 1>, scalar_prefetch = 1 : i64, scratch_operands = 0 : i64, tpu.core_type = #tpu.core_type<tc>, window_params = [{transform_indices = @transform_0, window_bounds = array<i64: 64, 128>}, {transform_indices = @transform_1, window_bounds = array<i64: 64, 128>}]} {
    %c0 = arith.constant 0 : index
    %0 = memref.load %arg2[%c0] : memref<3xi32, #tpu.memory_space<smem>>
    %c1 = arith.constant 1 : index
    %1 = memref.load %arg2[%c1] : memref<3xi32, #tpu.memory_space<smem>>
    %c2 = arith.constant 2 : index
    %2 = memref.load %arg2[%c2] : memref<3xi32, #tpu.memory_space<smem>>
    %3 = arith.addi %2, %arg1 : i32
    %c128_i32 = arith.constant 128 : i32
    %4 = arith.muli %3, %c128_i32 : i32
    %5 = tpu.iota {dimensions = array<i32: 1>} : vector<1x128xi32>
    %6 = vector.broadcast %4 : i32 to vector<1x128xi32>
    %7 = arith.addi %6, %5 : vector<1x128xi32>
    %8 = vector.broadcast %0 : i32 to vector<1x128xi32>
    %9 = arith.cmpi slt, %7, %8 : vector<1x128xi32>
    %10 = vector.broadcast %1 : i32 to vector<1x128xi32>
    %11 = arith.cmpi sge, %7, %10 : vector<1x128xi32>
    %12 = arith.ori %9, %11 : vector<1x128xi1>
    %c0_0 = arith.constant 0 : index
    %c0_1 = arith.constant 0 : index
    %13 = vector.load %arg3[%c0_0, %c0_1] : memref<64x128xf32, #tpu.memory_space<vmem>>, vector<64x128xf32>
    %cst = arith.constant 0.000000e+00 : f32
    %14 = vector.shape_cast %12 : vector<1x128xi1> to vector<1x128xi1>
    %15 = vector.broadcast %14 : vector<1x128xi1> to vector<64x128xi1>
    %16 = vector.broadcast %cst : f32 to vector<64x128xf32>
    %17 = arith.select %15, %13, %16 : vector<64x128xi1>, vector<64x128xf32>
    %c0_2 = arith.constant 0 : index
    %c0_3 = arith.constant 0 : index
    %18 = vector.load %arg4[%c0_2, %c0_3] : memref<64x128xf32, #tpu.memory_space<vmem>>, vector<64x128xf32>
    tpu.vector_store %arg4[%c0_2, %c0_3], %17 {strides = array<i32>} : memref<64x128xf32, #tpu.memory_space<vmem>>, vector<64x128xf32>,
    return
  }
  func.func @transform_0(%arg0: i32, %arg1: i32, %arg2: memref<3xi32, #tpu.memory_space<smem>>) -> (i32, i32) {
    %c2 = arith.constant 2 : index
    %0 = memref.load %arg2[%c2] : memref<3xi32, #tpu.memory_space<smem>>
    %1 = arith.addi %0, %arg1 : i32
    %c0_i32 = arith.constant 0 : i32
    return %arg0, %1 : i32, i32
  }
  func.func @transform_1(%arg0: i32, %arg1: i32, %arg2: memref<3xi32, #tpu.memory_space<smem>>) -> (i32, i32) {
    %c2 = arith.constant 2 : index
    %0 = memref.load %arg2[%c2] : memref<3xi32, #tpu.memory_space<smem>>
    %1 = arith.addi %0, %arg1 : i32
    %c0_i32 = arith.constant 0 : i32
    return %arg0, %1 : i32, i32
  }
}

</mosaic_0001>

<bundles_post_ra>
// kernel: branch_1_fun.2
= control target key start
LH: loop header
LB: loop body
LE: loop exit
PB: predicated region body
PF: predicated region fallthrough
CT: control target
= control target key end

     0   :  { %s414_s12 = smov [#allocation3]   ;;  %s472_s0 = inlined_call_operand.vmem [shape: s32[3], index: 0, kind: input, shape index: {}]   ;;  %s473_s1 = inlined_call_operand.vmem [shape: f32[8,2048], index: 1, kind: input, shape index: {}, may-alias: {1,2}]   ;;  %s474_s2 = inlined_call_operand.vmem [shape: f32[8,2048], index: 2, kind: output, shape index: {}, may-alias: {1,2}]  }
   0x1   :  { %s8_s11 = sshll.u32 %s472_s0, 4  ;;  %s9_s11 = int_to_ptr.vmem [resolvable:$true] %s8_s11 }
   0x2   :  { %11 = dma.vmem_to_smem %s9_s11, 16, %s414_s12, [#allocation2] }
   0x3   :  { %400 = dma.done.wait [#allocation2], 16 }
   0x4   :  { %401 = vsyncadd [#allocation2], 4294967280 }
   0x5   :  { %14 = sfence }
   0x6   :  { %s433_s13 = smov 0   ;;  %s435_s14 = smov 0  }
   0x7   :  { %s437_s15 = smov 0  }
   0x8 LB: > { %s29_s0 = sadd.s32 1, %s408_s14  ;;  %p339_p0 = scmp.ge.s32.totalorder %s412_s15, 1  ;;  %s412_s15 = sphi %s437_s15, %s20_s15   ;;  %s408_s14 = sphi %s435_s14, %s478_s14   ;;  %s404_s13 = sphi %s433_s13, %s477_s13  }
   0x9   : > { %p30_p1 = scmp.ge.s32.totalorder %s29_s0, 2  ;;  %p129_p2 = scmp.lt.s32.totalorder %s412_s15, 3 }
   0xb   : > { %s480_s0 = smov (%p30_p1, %s29_s0), 0  ;;  %p130_p3 = pnand %p339_p0, %p129_p2 }
   0xc   : > { %s340_s16 = sld [smem:[#allocation3 + $0x2]] (!%p130_p3) }
   0xd   : > { %133 = sbr.rel (%p130_p3) target bundleno = 32 (0x20), region = 24  ;;  %s189_s17 = sld [smem:[#allocation3]] (!%p130_p3) }
   0xe   : > { %s346_s18 = sld [smem:[#allocation3 + $0x1]] (!%p130_p3) }
  0x12   : > { %v194_v0 = vlaneseq  ;;  %s162_s19 = sadd.s32 %s404_s13, %s340_s16 }
  0x13   : > { %s341_s20 = sshll.u32 %s162_s19, 2  ;;  %s348_s21 = sshll.u32 %s162_s19, 9  ;;  %v204_v6 = vstv %s189_s17 }
  0x14   : > { %v195_v1 = vand.u32 127, %v194_v0  ;;  %p166_p4 = scmp.lt.s32.totalorder %s341_s20, 15  ;;  %v199_v5 = vstv %s348_s21  ;;  %v209_v7 = vstv %s346_s18 }
  0x16   : > { %v196_v2 = vadd.s32 128, %v195_v1  ;;  %v197_v3 = vadd.s32 256, %v195_v1  ;;  %v198_v4 = vadd.s32 384, %v195_v1  ;;  %v200_v8 = vadd.s32 %v199_v5, %v195_v1  ;;  %s482_s20 = smov (!%p166_p4, %s341_s20), 15 }
  0x17   : > { %s342_s22 = sshll.u32 %s482_s20, 3 }
  0x18   : > { %v201_v9 = vadd.s32 %v199_v5, %v196_v2  ;;  %v202_v10 = vadd.s32 %v199_v5, %v197_v3  ;;  %v203_v11 = vadd.s32 %v199_v5, %v198_v4  ;;  %vm205_vm0 = vcmp.lt.s32.totalorder %v200_v8, %v204_v6  ;;  %s171_s25 = scalar_lea.vmem %s473_s1, %s342_s22  ;;  %s185_s28 = scalar_lea.vmem %s474_s2, %s342_s22 }
  0x19   : > { %vm210_vm1 = vcmp.ge.s32.totalorder %v200_v8, %v209_v7  ;;  %v218_v13 = vld [vmem:[%s171_s25] sm:$0xff]  ;;  %v219_v14 = vld [vmem:[%s171_s25 + $0x8] sm:$0xff]  ;;  %v220_v15 = vld [vmem:[%s171_s25 + $0x10] sm:$0xff] }
  0x1a   : > { %vm206_vm2 = vcmp.lt.s32.totalorder %v201_v9, %v204_v6  ;;  %vm211_vm3 = vcmp.ge.s32.totalorder %v201_v9, %v209_v7  ;;  %vm451_vm4 = vmor %vm205_vm0, %vm210_vm1  ;;  %vm207_vm5 = vcmp.lt.s32.totalorder %v202_v10, %v204_v6  ;;  %vm212_vm6 = vcmp.ge.s32.totalorder %v202_v10, %v209_v7  ;;  %v221_v16 = vld [vmem:[%s171_s25 + $0x18] sm:$0xff] }
  0x1b   : > { %vm215_vm7 = vmor %vm206_vm2, %vm211_vm3  ;;  %vm208_vm8 = vcmp.lt.s32.totalorder %v203_v11, %v204_v6  ;;  %vm213_vm9 = vcmp.ge.s32.totalorder %v203_v11, %v209_v7  ;;  %v230_v17 = vsel %vm451_vm4, %v218_v13, 0.0 }
  0x1c   : > { %v231_v18 = vsel %vm215_vm7, %v219_v14, 0.0  ;;  %vm216_vm10 = vmor %vm207_vm5, %vm212_vm6  ;;  %234 = vst [vmem:[%s185_s28] sm:$0xff] %v230_v17 }
  0x1d   : > { %v232_v19 = vsel %vm216_vm10, %v220_v15, 0.0  ;;  %vm217_vm11 = vmor %vm208_vm8, %vm213_vm9  ;;  %235 = vst [vmem:[%s185_s28 + $0x8] sm:$0xff] %v231_v18 }
  0x1e   : > { %v233_v20 = vsel %vm217_vm11, %v221_v16, 0.0  ;;  %236 = vst [vmem:[%s185_s28 + $0x10] sm:$0xff] %v232_v19 }
  0x1f   : > { %237 = vst [vmem:[%s185_s28 + $0x18] sm:$0xff] %v233_v20 }
  0x20 PF: > { %s20_s15 = sadd.s32 1, %s412_s15   ;;  %s477_s13 = smov %s408_s14 }
  0x21   : > { %p17_p5 = scmp.ge.s32.totalorder %s20_s15, 4   ;;  %s478_s14 = smov %s480_s0 }
  0x23   :  { %19 = sbr.rel (!%p17_p5) target bundleno = 8 (0x8), region = 54 }

// kernel: branch_1_fun.3
= control target key start
LH: loop header
LB: loop body
LE: loop exit
PB: predicated region body
PF: predicated region fallthrough
CT: control target
= control target key end

     0   :  { %s391_s12 = smov [#allocation3]   ;;  %s463_s0 = inlined_call_operand.vmem [shape: s32[3], index: 0, kind: input, shape index: {}]   ;;  %s464_s1 = inlined_call_operand.vmem [shape: f32[128,128], index: 1, kind: input, shape index: {}, may-alias: {1,2}]   ;;  %s465_s2 = inlined_call_operand.vmem [shape: f32[128,128], index: 2, kind: output, shape index: {}, may-alias: {1,2}]  }
   0x1   :  { %s8_s11 = sshll.u32 %s463_s0, 4  ;;  %s9_s11 = int_to_ptr.vmem [resolvable:$true] %s8_s11 }
   0x2   :  { %11 = dma.vmem_to_smem %s9_s11, 16, %s391_s12, [#allocation2] }
   0x3   :  { %377 = dma.done.wait [#allocation2], 16 }
   0x4   :  { %378 = vsyncadd [#allocation2], 4294967280 }
   0x5   :  { %14 = sfence }
   0x6   :  { %s410_s13 = smov 0   ;;  %s412_s14 = smov 0  }
   0x7   :  { %s414_s15 = smov 0  }
   0x8 LB: > { %s32_s0 = sadd.s32 1, %s385_s14  ;;  %p316_p0 = scmp.ge.s32.totalorder %s389_s15, 1  ;;  %s389_s15 = sphi %s414_s15, %s20_s15   ;;  %s385_s14 = sphi %s412_s14, %s469_s14   ;;  %s381_s13 = sphi %s410_s13, %s468_s13  }
   0x9   : > { %p34_p1 = scmp.ge.s32.totalorder %s32_s0, 2  ;;  %p128_p2 = scmp.lt.s32.totalorder %s389_s15, 3 }
   0xb   : > { %s471_s0 = smov (%p34_p1, %s32_s0), 0  ;;  %p129_p3 = pnand %p316_p0, %p128_p2 }
   0xc   : > { %s317_s16 = sld [smem:[#allocation3 + $0x2]] (!%p129_p3)  ;;  %s318_s17 = sshll.u32 (!%p129_p3), %s381_s13, 3 }
   0xd   : > { %132 = sbr.rel (%p129_p3) target bundleno = 35 (0x23), region = 24  ;;  %p161_p4 = scmp.lt.s32.totalorder (!%p129_p3), %s318_s17, 15 }
   0xe   : > { %s184_s18 = sld [smem:[#allocation3]] (!%p129_p3) }
   0xf   : > { %s323_s19 = sld [smem:[#allocation3 + $0x1]] (!%p129_p3) }
  0x12   : > { %v189_v0 = vlaneseq  ;;  %s473_s17 = smov (!%p161_p4, %s318_s17), 15  ;;  %p163_p5 = scmp.lt.s32.totalorder %s317_s16, 0 }
  0x13   : > { %s325_s20 = sshll.u32 %s317_s16, 7 }
  0x14   : > { %v190_v1 = vand.u32 127, %v189_v0  ;;  %v191_v2 = vstv %s325_s20  ;;  %v193_v3 = vstv %s184_s18  ;;  %s475_s16 = smov (!%p163_p5, %s317_s16), 0 }
  0x15   : > { %v195_v5 = vstv %s323_s19  ;;  %s165_s21 = sadd.s32 %s475_s16, %s473_s17 }
  0x16   : > { %v192_v4 = vadd.s32 %v191_v2, %v190_v1  ;;  %s319_s22 = sshll.u32 %s165_s21, 3 }
  0x17   : > { %s167_s25 = scalar_lea.vmem %s464_s1, %s319_s22  ;;  %s180_s28 = scalar_lea.vmem %s465_s2, %s319_s22 }
  0x18   : > { %vm194_vm0 = vcmp.lt.s32.totalorder %v192_v4, %v193_v3  ;;  %vm196_vm1 = vcmp.ge.s32.totalorder %v192_v4, %v195_v5  ;;  %v198_v7 = vld [vmem:[%s167_s25] sm:$0xff]  ;;  %v199_v8 = vld [vmem:[%s167_s25 + $0x8] sm:$0xff]  ;;  %v200_v9 = vld [vmem:[%s167_s25 + $0x10] sm:$0xff] }
  0x19   : > { %vm428_vm2 = vmor %vm194_vm0, %vm196_vm1  ;;  %v201_v10 = vld [vmem:[%s167_s25 + $0x18] sm:$0xff]  ;;  %v202_v11 = vld [vmem:[%s167_s25 + $0x20] sm:$0xff] }
  0x1a   : > { %v203_v12 = vld [vmem:[%s167_s25 + $0x28] sm:$0xff]  ;;  %v208_v13 = vsel %vm428_vm2, %v198_v7, 0.0  ;;  %v209_v14 = vsel %vm428_vm2, %v199_v8, 0.0  ;;  %v204_v15 = vld [vmem:[%s167_s25 + $0x30] sm:$0xff]  ;;  %v205_v16 = vld [vmem:[%s167_s25 + $0x38] sm:$0xff]  ;;  %v210_v17 = vsel %vm428_vm2, %v200_v9, 0.0 }
  0x1b   : > { %216 = vst [vmem:[%s180_s28] sm:$0xff] %v208_v13  ;;  %v211_v18 = vsel %vm428_vm2, %v201_v10, 0.0  ;;  %v212_v19 = vsel %vm428_vm2, %v202_v11, 0.0  ;;  %v213_v20 = vsel %vm428_vm2, %v203_v12, 0.0  ;;  %v214_v21 = vsel %vm428_vm2, %v204_v15, 0.0 }
  0x1c   : > { %217 = vst [vmem:[%s180_s28 + $0x8] sm:$0xff] %v209_v14  ;;  %v215_v22 = vsel %vm428_vm2, %v205_v16, 0.0 }
  0x1d   : > { %218 = vst [vmem:[%s180_s28 + $0x10] sm:$0xff] %v210_v17 }
  0x1e   : > { %219 = vst [vmem:[%s180_s28 + $0x18] sm:$0xff] %v211_v18 }
  0x1f   : > { %220 = vst [vmem:[%s180_s28 + $0x20] sm:$0xff] %v212_v19 }
  0x20   : > { %221 = vst [vmem:[%s180_s28 + $0x28] sm:$0xff] %v213_v20 }
  0x21   : > { %222 = vst [vmem:[%s180_s28 + $0x30] sm:$0xff] %v214_v21 }
  0x22   : > { %223 = vst [vmem:[%s180_s28 + $0x38] sm:$0xff] %v215_v22 }
  0x23 PF: > { %s20_s15 = sadd.s32 1, %s389_s15   ;;  %s468_s13 = smov %s385_s14 }
  0x24   : > { %p17_p6 = scmp.ge.s32.totalorder %s20_s15, 4   ;;  %s469_s14 = smov %s471_s0 }
  0x26   :  { %19 = sbr.rel (!%p17_p6) target bundleno = 8 (0x8), region = 54 }

</bundles_post_ra>
